<compile_context>
chip_gen: v5e
topology: v5e:2x2
jax: 0.10.0
libtpu: 0.0.40
codegen_flags: <defaults>
</compile_context>

<pallas_src>
import jax
import jax.numpy as jnp
from jax import lax
from jax.experimental import pallas as pl
from jax.experimental.pallas import tpu as pltpu


def _multi_head_kernel(x_ref, w1_ref, b1_ref, w2_ref, b2_ref, o_ref):
    # fc1: contract latent axes of w1 (8, L) and x (TB, L) -> (8, TB).
    # The x-tile transpose happens on-chip (XLU), hidden under the HBM DMA.
    h = lax.dot_general(
        w1_ref[...], x_ref[...],
        dimension_numbers=(((1,), (1,)), ((), ())),
        preferred_element_type=jnp.float32,
    )
    h = jnp.maximum(h + b1_ref[...], 0.0)
    # TODO(synk): Dropout(p=0.5) implemented as identity (eval mode). A
    # training-mode forward would need pltpu.prng_seed + prng_random_bits
    # masking with 1/(1-p) scaling.
    # fc2: (out, 8) @ (8, TB) -> (out, TB). Tiny K; off the memory-bound
    # critical path.
    o = jnp.dot(w2_ref[...], h.astype(w2_ref.dtype),
                preferred_element_type=jnp.float32)
    o_ref[...] = (o + b2_ref[...]).astype(o_ref.dtype)


def _cdiv(a, b):
    return (a + b - 1) // b


def _round_up(n, m):
    return ((n + m - 1) // m) * m


def _choose_batch_tile(B, block_b):
    """Lane-dense (multiple-of-128) batch tile.

    Balances tiles so the last one isn't mostly padding and, when the batch is
    large enough, keeps >= 2 grid steps so v7x's two TensorCores both work.
    """
    B128 = _round_up(B, 128)
    tb_max = max(128, min(_round_up(block_b, 128), B128))
    if B128 >= 256:
        tb_max = min(tb_max, _round_up(_cdiv(B128, 2), 128))
    n_tiles = _cdiv(B128, tb_max)
    return _round_up(_cdiv(B128, n_tiles), 128)


def multi_head_forward(x, w1, b1, w2, b2, *, block_b=32768):
    """x: (B, latent_dim); w1: (8, latent_dim); b1: (8, 1);
    w2: (output_size, 8); b2: (output_size, 1). Returns (B, output_size)."""
    B, latent_dim = x.shape
    out_dim, hidden = w2.shape

    TB = _choose_batch_tile(B, block_b)
    grid = (_cdiv(B, TB),)

    itemsize = jnp.dtype(x.dtype).itemsize
    cost = pl.CostEstimate(
        flops=2 * B * (hidden * latent_dim + out_dim * hidden),
        transcendentals=0,
        bytes_accessed=itemsize * (B * (latent_dim + out_dim)
                                   + hidden * (latent_dim + 1)
                                   + out_dim * (hidden + 1)),
    )

    out_t = pl.pallas_call(
        _multi_head_kernel,
        out_shape=jax.ShapeDtypeStruct((out_dim, B), x.dtype),
        grid=grid,
        in_specs=[
            # Streamed, double-buffered batch tiles of x in native layout.
            pl.BlockSpec((TB, latent_dim), lambda i: (i, 0)),
            # Weights / biases: constant index_map -> VMEM-resident across grid.
            pl.BlockSpec(w1.shape, lambda i: (0, 0)),
            pl.BlockSpec(b1.shape, lambda i: (0, 0)),
            pl.BlockSpec(w2.shape, lambda i: (0, 0)),
            pl.BlockSpec(b2.shape, lambda i: (0, 0)),
        ],
        # Lane-dense output: batch on the 128-wide lane axis, unmasked stores.
        out_specs=pl.BlockSpec((out_dim, TB), lambda i: (0, i)),
        compiler_params=pltpu.CompilerParams(
            dimension_semantics=("parallel",)),   # 2-TC sharding on v7x
        cost_estimate=cost,
    )(x, w1, b1, w2, b2)

    # Cheap wrapper transpose of the small (out_dim, B) result.
    return jnp.transpose(out_t)                  # (B, output_size)


def init_params(key, latent_dim, output_size, dtype=jnp.float32):
    """Deterministic init matching nn.Linear default U(-1/sqrt(fan_in), +).
    Weights kept in PyTorch (out, in) layout; biases shaped (out, 1)."""
    k1, k2, k3, k4 = jax.random.split(key, 4)
    hidden = 8
    bound1 = 1.0 / (latent_dim ** 0.5)
    bound2 = 1.0 / (hidden ** 0.5)
    w1 = jax.random.uniform(k1, (hidden, latent_dim), dtype, -bound1, bound1)
    b1 = jax.random.uniform(k2, (hidden, 1), dtype, -bound1, bound1)
    w2 = jax.random.uniform(k3, (output_size, hidden), dtype, -bound2, bound2)
    b2 = jax.random.uniform(k4, (output_size, 1), dtype, -bound2, bound2)
    return w1, b1, w2, b2


if __name__ == "__main__":
    latent_dim = 32
    output_size = 4
    batch = 8

    key = jax.random.PRNGKey(0)
    kx, kp = jax.random.split(key)
    x = jax.random.normal(kx, (batch, latent_dim), jnp.float32)
    w1, b1, w2, b2 = init_params(kp, latent_dim, output_size)

    out = multi_head_forward(x, w1, b1, w2, b2)
    out = jax.block_until_ready(out)

    # Pure-JAX reference (dropout in eval mode == identity), standard layout.
    ref = jnp.maximum(x @ w1.T + b1[:, 0], 0.0) @ w2.T + b2[:, 0]
    assert out.shape == (batch, output_size)
    assert jnp.allclose(out, ref, atol=1e-5, rtol=1e-5)

    # Larger, non-tile-aligned batch to exercise edge clipping + multi-tile grid.
    batch2 = 1000
    x2 = jax.random.normal(kx, (batch2, latent_dim), jnp.float32)
    out2 = jax.block_until_ready(multi_head_forward(x2, w1, b1, w2, b2,
                                                    block_b=512))
    ref2 = jnp.maximum(x2 @ w1.T + b1[:, 0], 0.0) @ w2.T + b2[:, 0]
    assert out2.shape == (batch2, output_size)
    assert jnp.allclose(out2, ref2, atol=1e-5, rtol=1e-5)

    print("KERNEL_OK")
</pallas_src>

<mosaic_0001>
module attributes {stable_mosaic.version = 11 : i64} {
  func.func @_multi_head_kernel(%arg0: i32, %arg1: memref<128x32xf32, #tpu.memory_space<vmem>>, %arg2: memref<8x32xf32, #tpu.memory_space<vmem>>, %arg3: memref<8x1xf32, #tpu.memory_space<vmem>>, %arg4: memref<4x8xf32, #tpu.memory_space<vmem>>, %arg5: memref<4x1xf32, #tpu.memory_space<vmem>>, %arg6: memref<4x128xf32, #tpu.memory_space<vmem>>) attributes {dimension_semantics = [#tpu.dimension_semantics<parallel>], iteration_bounds = array<i64: 1>, scalar_prefetch = 0 : i64, scratch_operands = 0 : i64, tpu.core_type = #tpu.core_type<tc>, window_params = [{transform_indices = @transform_0, window_bounds = array<i64: 128, 32>}, {pipeline_mode = #tpu.pipeline_mode<synchronous>, transform_indices = @transform_1, window_bounds = array<i64: 8, 32>}, {pipeline_mode = #tpu.pipeline_mode<synchronous>, transform_indices = @transform_2, window_bounds = array<i64: 8, 1>}, {pipeline_mode = #tpu.pipeline_mode<synchronous>, transform_indices = @transform_3, window_bounds = array<i64: 4, 8>}, {pipeline_mode = #tpu.pipeline_mode<synchronous>, transform_indices = @transform_4, window_bounds = array<i64: 4, 1>}, {transform_indices = @transform_5, window_bounds = array<i64: 4, 128>}]} {
    %c0 = arith.constant 0 : index
    %c0_0 = arith.constant 0 : index
    %0 = vector.load %arg2[%c0, %c0_0] : memref<8x32xf32, #tpu.memory_space<vmem>>, vector<8x32xf32>
    %c0_1 = arith.constant 0 : index
    %c0_2 = arith.constant 0 : index
    %1 = vector.load %arg1[%c0_1, %c0_2] : memref<128x32xf32, #tpu.memory_space<vmem>>, vector<128x32xf32>
    %cst = arith.constant dense<0.000000e+00> : vector<8x128xf32>
    %2 = tpu.matmul %0, %1, %cst {dimension_numbers = #tpu.dot_dimension_numbers<[1], [1], [0], [0], [0, 0, 1, 0], [], []>} : vector<8x32xf32>, vector<128x32xf32>, vector<8x128xf32> -> vector<8x128xf32>
    %c0_3 = arith.constant 0 : index
    %c0_4 = arith.constant 0 : index
    %3 = vector.load %arg3[%c0_3, %c0_4] : memref<8x1xf32, #tpu.memory_space<vmem>>, vector<8x1xf32>
    %4 = vector.broadcast %3 : vector<8x1xf32> to vector<8x128xf32>
    %5 = arith.addf %2, %4 : vector<8x128xf32>
    %cst_5 = arith.constant 0.000000e+00 : f32
    %6 = vector.broadcast %cst_5 : f32 to vector<8x128xf32>
    %7 = arith.maximumf %5, %6 : vector<8x128xf32>
    %c0_6 = arith.constant 0 : index
    %c0_7 = arith.constant 0 : index
    %8 = vector.load %arg4[%c0_6, %c0_7] : memref<4x8xf32, #tpu.memory_space<vmem>>, vector<4x8xf32>
    %cst_8 = arith.constant dense<0.000000e+00> : vector<4x128xf32>
    %9 = tpu.matmul %8, %7, %cst_8 {dimension_numbers = #tpu.dot_dimension_numbers<[1], [0], [0], [1], [0, 0, 1, 1], [], []>} : vector<4x8xf32>, vector<8x128xf32>, vector<4x128xf32> -> vector<4x128xf32>
    %c0_9 = arith.constant 0 : index
    %c0_10 = arith.constant 0 : index
    %10 = vector.load %arg5[%c0_9, %c0_10] : memref<4x1xf32, #tpu.memory_space<vmem>>, vector<4x1xf32>
    %11 = vector.broadcast %10 : vector<4x1xf32> to vector<4x128xf32>
    %12 = arith.addf %9, %11 : vector<4x128xf32>
    %c0_11 = arith.constant 0 : index
    %c0_12 = arith.constant 0 : index
    %13 = vector.load %arg6[%c0_11, %c0_12] : memref<4x128xf32, #tpu.memory_space<vmem>>, vector<4x128xf32>
    tpu.vector_store %arg6[%c0_11, %c0_12], %12 {strides = array<i32>} : memref<4x128xf32, #tpu.memory_space<vmem>>, vector<4x128xf32>,
    return
  }
  func.func @transform_0(%arg0: i32) -> (i32, i32) {
    %c0_i32 = arith.constant 0 : i32
    %c0_i32_0 = arith.constant 0 : i32
    return %arg0, %c0_i32 : i32, i32
  }
  func.func @transform_1(%arg0: i32) -> (i32, i32) {
    %c0_i32 = arith.constant 0 : i32
    %c0_i32_0 = arith.constant 0 : i32
    %c0_i32_1 = arith.constant 0 : i32
    return %c0_i32, %c0_i32_0 : i32, i32
  }
  func.func @transform_2(%arg0: i32) -> (i32, i32) {
    %c0_i32 = arith.constant 0 : i32
    %c0_i32_0 = arith.constant 0 : i32
    %c0_i32_1 = arith.constant 0 : i32
    return %c0_i32, %c0_i32_0 : i32, i32
  }
  func.func @transform_3(%arg0: i32) -> (i32, i32) {
    %c0_i32 = arith.constant 0 : i32
    %c0_i32_0 = arith.constant 0 : i32
    %c0_i32_1 = arith.constant 0 : i32
    return %c0_i32, %c0_i32_0 : i32, i32
  }
  func.func @transform_4(%arg0: i32) -> (i32, i32) {
    %c0_i32 = arith.constant 0 : i32
    %c0_i32_0 = arith.constant 0 : i32
    %c0_i32_1 = arith.constant 0 : i32
    return %c0_i32, %c0_i32_0 : i32, i32
  }
  func.func @transform_5(%arg0: i32) -> (i32, i32) {
    %c0_i32 = arith.constant 0 : i32
    %c0_i32_0 = arith.constant 0 : i32
    return %c0_i32, %arg0 : i32, i32
  }
}

</mosaic_0001>

<bundles_post_ra>
// kernel: tpu_custom_call.1
= control target key start
LH: loop header
LB: loop body
LE: loop exit
PB: predicated region body
PF: predicated region fallthrough
CT: control target
= control target key end

     0   :  { %10 = vsyncpa [#allocation3], 0  ;;  %s367_s0 = inlined_call_operand.vmem [shape: f32[8,32], index: 0, kind: input, shape index: {}]   ;;  %s368_s1 = inlined_call_operand.hbm [shape: f32[8,32], index: 1, kind: input, shape index: {}]   ;;  %s369_s2 = inlined_call_operand.vmem [shape: f32[8,1], index: 2, kind: input, shape index: {}]   ;;  %s370_s3 = inlined_call_operand.vmem [shape: f32[4,8], index: 3, kind: input, shape index: {}]   ;;  %s371_s4 = inlined_call_operand.vmem [shape: f32[4,1], index: 4, kind: input, shape index: {}]   ;;  %s372_s5 = inlined_call_operand.hbm [shape: f32[4,8], index: 5, kind: output, shape index: {}]  }
   0x1   :  { %11 = vsyncpa [#allocation4], 0  ;;  %s19_s20 = sshll.u32 %s368_s1, 4  ;;  %s254_s21 = smov [#allocation2]   ;;  %s20_s20 = int_to_ptr.hbm [resolvable:$true] %s19_s20 }
   0x2   :  { %s21_s22 = sshll.u32 %s254_s21, 4  ;;  %s22_s22 = int_to_ptr.vmem [resolvable:$true] %s21_s22 }
   0x3   :  { %24 = dma.hbm_to_vmem [thread:$0]  %s20_s20, 128, %s22_s22, [#allocation3]  }
   0x4   :  { %250 = dma.done.wait [#allocation3], 128  }
   0x5   :  { %251 = vsyncadd [#allocation3], 4294967168  ;;  %vm58_vm0 = vcmask 261120   ;;  %v51_v0 = vld [vmem:[%s367_s0 + $0x78] sm:$0xff]  ;;  %v50_v1 = vld [vmem:[%s367_s0 + $0x70] sm:$0xff]  ;;  %v255_v10 = vmov 0  }
   0x6   :  { %180 = vmatpush.xpose.msk.msra.mxu0 %vm58_vm0, %v51_v0  ;;  %v49_v2 = vld [vmem:[%s367_s0 + $0x68] sm:$0xff]  ;;  %v48_v3 = vld [vmem:[%s367_s0 + $0x60] sm:$0xff]  ;;  %v47_v4 = vld [vmem:[%s367_s0 + $0x58] sm:$0xff]  ;;  %201 = vset.pattern.permute.xlu0 %v255_v10  ;;  %vm138_vm1 = vcmask 64512   ;;  %s256_s7 = smov [#allocation5]   ;;  %s170_s10 = sshll.u32 %s372_s5, 4  ;;  %s171_s10 = int_to_ptr.hbm [resolvable:$true] %s170_s10 }
   0x7   :  { %v46_v5 = vld [vmem:[%s367_s0 + $0x50] sm:$0xff]  ;;  %v45_v6 = vld [vmem:[%s367_s0 + $0x48] sm:$0xff]  ;;  %v44_v7 = vld [vmem:[%s367_s0 + $0x40] sm:$0xff]  ;;  %s168_s8 = sshll.u32 %s256_s7, 4  ;;  %s169_s8 = int_to_ptr.vmem [resolvable:$true] %s168_s8 }
   0x8   :  { %v43_v8 = vld [vmem:[%s367_s0 + $0x38] sm:$0xff]  ;;  %v52_v9 = vld [vmem:[%s369_s2] sm:$0xff]  ;;  %v42_v11 = vld [vmem:[%s367_s0 + $0x30] sm:$0xff] }
   0x9   :  { %55 = vperm.xlu0 %201, %v52_v9   ;;  %v41_v12 = vld [vmem:[%s367_s0 + $0x28] sm:$0xff]  ;;  %v132_v13 = vld [vmem:[%s371_s4] sm:$0xf]  ;;  %v39_v15 = vld [vmem:[%s367_s0 + $0x18] sm:$0xff] }
   0xa   :  { %181 = vmatpush.xpose.msk.msra.mxu0 %vm58_vm0, %v50_v1  ;;  %v40_v14 = vld [vmem:[%s367_s0 + $0x20] sm:$0xff]  ;;  %v38_v16 = vld [vmem:[%s367_s0 + $0x10] sm:$0xff]  ;;  %v37_v17 = vld [vmem:[%s367_s0 + $0x8] sm:$0xff] }
   0xb   :  { %v36_v18 = vld [vmem:[%s367_s0] sm:$0xff] }
   0xc   :  { %v35_v19 = vld [vmem:[#allocation2] sm:$0xff] }
   0xd   :  { %v131_v24 = vld [vmem:[%s370_s3] sm:$0xf] }
   0xe   :  { %182 = vmatpush.xpose.msk.msra.mxu0 %vm58_vm0, %v49_v2 }
  0x11   :  { %135 = vperm.xlu0 %201, %v132_v13  }
  0x12   :  { %183 = vmatpush.xpose.msk.msra.mxu0 %vm58_vm0, %v48_v3 }
  0x16   :  { %184 = vmatpush.xpose.msk.msra.mxu0 %vm58_vm0, %v47_v4 }
  0x1a   :  { %185 = vmatpush.xpose.msk.msra.mxu0 %vm58_vm0, %v46_v5 }
  0x1e   :  { %186 = vmatpush.xpose.msk.msra.mxu0 %vm58_vm0, %v45_v6 }
  0x22   :  { %187 = vmatpush.xpose.msk.msra.mxu0 %vm58_vm0, %v44_v7 }
  0x26   :  { %188 = vmatpush.xpose.msk.msra.mxu0 %vm58_vm0, %v43_v8 }
  0x2a   :  { %189 = vmatpush.xpose.msk.msra.mxu0 %vm58_vm0, %v42_v11 }
  0x2e   :  { %190 = vmatpush.xpose.msk.msra.mxu0 %vm58_vm0, %v41_v12 }
  0x32   :  { %191 = vmatpush.xpose.msk.msra.mxu0 %vm58_vm0, %v40_v14 }
  0x36   :  { %192 = vmatpush.xpose.msk.msra.mxu0 %vm58_vm0, %v39_v15 }
  0x3a   :  { %193 = vmatpush.xpose.msk.msra.mxu0 %vm58_vm0, %v38_v16 }
  0x3e   :  { %194 = vmatpush.xpose.msk.msra.mxu0 %vm58_vm0, %v37_v17 }
  0x42   :  { %195 = vmatpush.xpose.msk.msra.mxu0 %vm58_vm0, %v36_v18 }
  0x45   :  { %196 = vmatmul.msk.f32.vlgmr.msra.gmra.mxu0 %vm58_vm0, %v35_v19 }
  0x7b   :  { %v56_v20 = vpop.permute.xlu0 %55 }
  0x83   :  { %v136_v25 = vpop.permute.xlu0 %135 }
  0xc2   :  { %v127_v21 = vpop.f32.mrf.mxu0 }
  0xc3   :  { %v128_v22 = vadd.f32 %v127_v21, %v56_v20 }
  0xc5   :  { %v130_v23 = vmax.f32 %v128_v22, 0.0 }
  0xc7   :  { %157 = vmatpush.msra.mxu1 %v130_v23 }
  0xc8   :  { %197 = vmatmul.msk.f32.vlgmr.msra.gmra.mxu1 %vm138_vm1, %v131_v24 }
 0x145   :  { %v159_v26 = vpop.f32.mrf.mxu1 }
 0x146   :  { %v160_v27 = vadd.f32 %v159_v26, %v136_v25 }
 0x148   :  { %162 = vst [vmem:[#allocation5] sm:$0xf] %v160_v27 }
 0x149   :  { %173 = dma.vmem_to_hbm [thread:$0]  %s169_s8, 64, %s171_s10, [#allocation4]  }
 0x14a   :  { %252 = dma.done.wait [#allocation4], 64  }
 0x14b   :  { %253 = vsyncadd [#allocation4], 4294967232 }
 0x14c   :  { %178 = vsyncpa [#allocation3], 1 }
 0x14d   :  { %179 = vsyncpa [#allocation4], 1 }

</bundles_post_ra>
